<compile_context>
chip_gen: v5e
topology: v5e:2x2
jax: 0.10.0
libtpu: 0.0.40
codegen_flags: <defaults>
</compile_context>

<pallas_src>
import functools

import jax
import jax.numpy as jnp
from jax import lax
from jax.experimental import pallas as pl
from jax.experimental.pallas import tpu as pltpu


def _prenorm_ffn_kernel(x_ref, g_ref, beta_ref, w1_ref, b1_ref, w2_ref, b2_ref,
                        o_ref, xn_ref, acc_ref, *, eps):
    """One (tm, D) row tile x one tH hidden chunk.

    x_ref:  (tm, D) f32     g_ref/beta_ref: (1, D) f32
    w1_ref: (D, tH) bf16    b1_ref: (1, tH) f32
    w2_ref: (tH, D) bf16    b2_ref: (1, D) f32
    o_ref:  (tm, D)         xn_ref: (tm, D) bf16 scratch   acc_ref: (tm, D) f32 scratch
    """
    k = pl.program_id(1)

    @pl.when(k == 0)
    def _():
        # LayerNorm over the last axis (f32 on VPU/XLU, rsqrt on EUP); once per row tile.
        x = x_ref[...].astype(jnp.float32)
        mean = jnp.mean(x, axis=-1, keepdims=True)
        xc = x - mean
        var = jnp.mean(xc * xc, axis=-1, keepdims=True)
        inv = lax.rsqrt(var + eps)
        xn = xc * inv * g_ref[...] + beta_ref[...]
        xn_ref[...] = xn.astype(jnp.bfloat16)
        acc_ref[...] = jnp.zeros_like(acc_ref)

    # fn: Linear -> ReLU -> Dropout(p=0) -> Linear -> Dropout(p=0), one H-chunk at a time.
    h = jnp.dot(xn_ref[...], w1_ref[...],
                preferred_element_type=jnp.float32) + b1_ref[...]
    h = jnp.maximum(h, 0.0)                          # ReLU; Dropout(p=0) == identity
    acc_ref[...] += jnp.dot(h.astype(jnp.bfloat16), w2_ref[...],
                            preferred_element_type=jnp.float32)

    @pl.when(k == pl.num_programs(1) - 1)
    def _():
        o_ref[...] = (acc_ref[...] + b2_ref[...]).astype(o_ref.dtype)


def _round_up(n, m):
    return pl.cdiv(n, m) * m


def _vmem_budget_bytes():
    """Per-core VMEM budget with ~15% headroom (v5e/v6e: 128 MiB, v7x: 64 MiB)."""
    try:
        cap = pltpu.get_tpu_info().vmem_capacity_bytes
    except Exception:
        cap = 64 * 1024 * 1024          # conservative fallback: assume v7x-sized VMEM
    return int(cap * 0.85)


def _choose_row_tile(N, tm_max):
    """Pick (tm_eff, n_pad).  Prefer no padding, MXU-friendly heights, and >=2 grid
    steps so both v7x TensorCores get work under dimension_semantics=("parallel",...)."""
    if 16 <= N <= 2 * tm_max and N % 16 == 0:
        return N // 2, N                 # two parallel row tiles, no padding
    if N <= tm_max:
        return N, N                      # single full-extent tile, no padding
    for align in (256, 128, 8):          # largest divisor of N, prefer 256/128 heights
        t = (tm_max // align) * align
        while t >= align:
            if N % t == 0:
                return t, N
            t -= align
    # Fallback: pad the ragged tail (costs an extra copy of x; avoided whenever possible).
    n_pad = _round_up(N, 8)
    t = (tm_max // 8) * 8
    while t >= 8:
        if n_pad % t == 0:
            return t, n_pad
        t -= 8
    return 8, n_pad


def _choose_h_tile(H, th_max):
    """Largest lane-aligned (multiple-of-128) divisor of H <= th_max, or H if it fits."""
    if H <= th_max:
        return H
    for align in (512, 256, 128):
        t = (th_max // align) * align
        while t >= align:
            if H % t == 0:
                return t
            t -= align
    return H                             # no lane-aligned divisor: keep H unchunked


def prenorm2pm(x, gamma, beta, w1, b1, w2, b2, prob=None, *,
               eps=1e-5, tm=None, th=None, out_dtype=None):
    """PreNorm2pm forward: fn(LayerNorm(x), prob) with fn = FFN (Linear->ReLU->Linear).

    x: (B, S, D). gamma/beta: (D,). w1: (D, H), b1: (H,), w2: (H, D), b2: (D,).
    prob: accepted (passed to fn in the PyTorch module) but unused by the eval-mode FFN.
    Returns (B, S, D) in `out_dtype` (default: x.dtype; pass jnp.bfloat16 to halve
    writeback bytes when the consumer accepts bf16).
    """
    del prob  # TODO(synk): `fn` is arbitrary in PreNorm2pm; modeled as the repo FFN,
              # which does not consume `prob` in eval mode (dropout p=0).
    B, S, D = x.shape
    H = w1.shape[1]
    N = B * S
    out_dtype = x.dtype if out_dtype is None else out_dtype

    vmem_budget = _vmem_budget_bytes()
    # Larger row tiles only on the 128 MiB-VMEM parts (v5e/v6e); 256 elsewhere (v7x).
    tm_max = tm if tm is not None else (512 if vmem_budget >= 80 * 1024 * 1024 else 256)
    th_max = th if th is not None else 512

    tm_eff, n_pad = _choose_row_tile(N, tm_max)
    th_eff = _choose_h_tile(H, th_max)
    n_row_tiles = n_pad // tm_eff
    n_h_chunks = H // th_eff

    x2 = x.reshape(N, D)
    if n_pad != N:
        # Rare fallback (N has no usable divisor); junk rows are sliced off below.
        x2 = jnp.pad(x2, ((0, n_pad - N), (0, 0)))

    gamma2 = gamma.reshape(1, D).astype(jnp.float32)
    beta2 = beta.reshape(1, D).astype(jnp.float32)
    w1_bf = w1.astype(jnp.bfloat16)
    w2_bf = w2.astype(jnp.bfloat16)
    b1_2 = b1.reshape(1, H).astype(jnp.float32)
    b2_2 = b2.reshape(1, D).astype(jnp.float32)

    kernel = functools.partial(_prenorm_ffn_kernel, eps=eps)

    out_itemsize = jnp.dtype(out_dtype).itemsize
    cost = pl.CostEstimate(
        flops=4 * n_pad * D * H,                             # two matmuls
        transcendentals=n_pad,                               # one rsqrt per row
        bytes_accessed=(n_pad * D * 4                        # read x (f32)
                        + n_pad * D * out_itemsize           # write y
                        + 4 * D * H                          # bf16 w1 + w2
                        + 4 * (D + H) + 12 * D),             # biases + gamma/beta
    )

    out = pl.pallas_call(
        kernel,
        out_shape=jax.ShapeDtypeStruct((n_pad, D), out_dtype),
        grid=(n_row_tiles, n_h_chunks),
        in_specs=[
            pl.BlockSpec((tm_eff, D), lambda i, k: (i, 0)),     # x row tile
            pl.BlockSpec((1, D), lambda i, k: (0, 0)),          # LayerNorm gamma (KiB)
            pl.BlockSpec((1, D), lambda i, k: (0, 0)),          # LayerNorm beta  (KiB)
            pl.BlockSpec((D, th_eff), lambda i, k: (0, k)),     # w1 chunk (bf16, streamed)
            pl.BlockSpec((1, th_eff), lambda i, k: (0, k)),     # b1 chunk
            pl.BlockSpec((th_eff, D), lambda i, k: (k, 0)),     # w2 chunk (bf16, streamed)
            pl.BlockSpec((1, D), lambda i, k: (0, 0)),          # b2 (KiB)
        ],
        out_specs=pl.BlockSpec((tm_eff, D), lambda i, k: (i, 0)),
        scratch_shapes=[
            pltpu.VMEM((tm_eff, D), jnp.bfloat16),   # cached LayerNorm output (per row tile)
            pltpu.VMEM((tm_eff, D), jnp.float32),    # FFN accumulator across H chunks
        ],
        compiler_params=pltpu.CompilerParams(
            dimension_semantics=("parallel", "arbitrary"),
            vmem_limit_bytes=vmem_budget,
        ),
        cost_estimate=cost,
    )(x2, gamma2, beta2, w1_bf, b1_2, w2_bf, b2_2)

    return out[:N].reshape(B, S, D)


def prenorm2pm_ref(x, gamma, beta, w1, b1, w2, b2, eps=1e-5):
    mean = x.mean(-1, keepdims=True)
    var = ((x - mean) ** 2).mean(-1, keepdims=True)
    xn = (x - mean) / jnp.sqrt(var + eps) * gamma + beta
    h = jnp.maximum(jnp.einsum("bsd,dh->bsh", xn, w1) + b1, 0.0)
    return jnp.einsum("bsh,hd->bsd", h, w2) + b2


if __name__ == "__main__":
    # Small but lane-dense shapes: D and H multiples of 128 so loads/stores are full-width.
    B, S, D, H = 2, 8, 128, 256
    key = jax.random.PRNGKey(0)
    kx, kg, kbt, k1, kb1, k2, kb2 = jax.random.split(key, 7)

    x = jax.random.normal(kx, (B, S, D), dtype=jnp.float32)
    gamma = jnp.ones((D,), jnp.float32) + 0.01 * jax.random.normal(kg, (D,), jnp.float32)
    beta = 0.01 * jax.random.normal(kbt, (D,), jnp.float32)

    # nn.Linear(dim, hidden): weight (H, D) stored transposed as (D, H); bias (H,)
    bound1 = 1.0 / (D ** 0.5)
    w1 = jax.random.uniform(k1, (D, H), minval=-bound1, maxval=bound1, dtype=jnp.float32)
    b1 = jax.random.uniform(kb1, (H,), minval=-bound1, maxval=bound1, dtype=jnp.float32)
    # nn.Linear(hidden, dim): weight (D, H) stored transposed as (H, D); bias (D,)
    bound2 = 1.0 / (H ** 0.5)
    w2 = jax.random.uniform(k2, (H, D), minval=-bound2, maxval=bound2, dtype=jnp.float32)
    b2 = jax.random.uniform(kb2, (D,), minval=-bound2, maxval=bound2, dtype=jnp.float32)

    prob = 0.0  # passed through the module signature; unused by the eval-mode FFN

    y = prenorm2pm(x, gamma, beta, w1, b1, w2, b2, prob)
    jax.block_until_ready(y)

    y_ref = prenorm2pm_ref(x, gamma, beta, w1, b1, w2, b2)
    assert y.shape == (B, S, D)
    # bf16 MXU inputs with f32 accumulation -> loose tolerance vs. f32 reference.
    assert jnp.allclose(y, y_ref, atol=5e-2, rtol=5e-2), "mismatch vs reference"
    print("KERNEL_OK")
</pallas_src>

<mosaic_0001>
module attributes {stable_mosaic.version = 11 : i64} {
  func.func @_prenorm_ffn_kernel(%arg0: i32, %arg1: i32, %arg2: memref<8x128xf32, #tpu.memory_space<vmem>>, %arg3: memref<1x128xf32, #tpu.memory_space<vmem>>, %arg4: memref<1x128xf32, #tpu.memory_space<vmem>>, %arg5: memref<128x256xbf16, #tpu.memory_space<vmem>>, %arg6: memref<1x256xf32, #tpu.memory_space<vmem>>, %arg7: memref<256x128xbf16, #tpu.memory_space<vmem>>, %arg8: memref<1x128xf32, #tpu.memory_space<vmem>>, %arg9: memref<8x128xf32, #tpu.memory_space<vmem>>, %arg10: memref<8x128xbf16, #tpu.memory_space<vmem>>, %arg11: memref<8x128xf32, #tpu.memory_space<vmem>>) attributes {dimension_semantics = [#tpu.dimension_semantics<parallel>, #tpu.dimension_semantics<arbitrary>], iteration_bounds = array<i64: 2, 1>, scalar_prefetch = 0 : i64, scratch_operands = 2 : i64, tpu.core_type = #tpu.core_type<tc>, window_params = [{transform_indices = @transform_0, window_bounds = array<i64: 8, 128>}, {pipeline_mode = #tpu.pipeline_mode<synchronous>, transform_indices = @transform_1, window_bounds = array<i64: 1, 128>}, {pipeline_mode = #tpu.pipeline_mode<synchronous>, transform_indices = @transform_2, window_bounds = array<i64: 1, 128>}, {transform_indices = @transform_3, window_bounds = array<i64: 128, 256>}, {transform_indices = @transform_4, window_bounds = array<i64: 1, 256>}, {transform_indices = @transform_5, window_bounds = array<i64: 256, 128>}, {pipeline_mode = #tpu.pipeline_mode<synchronous>, transform_indices = @transform_6, window_bounds = array<i64: 1, 128>}, {transform_indices = @transform_7, window_bounds = array<i64: 8, 128>}]} {
    %c0_i32 = arith.constant 0 : i32
    %0 = arith.cmpi eq, %arg1, %c0_i32 : i32
    %1 = arith.extui %0 : i1 to i32
    %c0_i32_0 = arith.constant 0 : i32
    %2 = arith.cmpi ne, %1, %c0_i32_0 : i32
    scf.if %2 {
      %c0_16 = arith.constant 0 : index
      %c0_17 = arith.constant 0 : index
      %20 = vector.load %arg2[%c0_16, %c0_17] : memref<8x128xf32, #tpu.memory_space<vmem>>, vector<8x128xf32>
      %cst_18 = arith.constant dense<0.000000e+00> : vector<8xf32>
      %21 = vector.multi_reduction <add>, %20, %cst_18 [1] : vector<8x128xf32> to vector<8xf32>
      %22 = vector.shape_cast %21 : vector<8xf32> to vector<8x1xf32>
      %cst_19 = arith.constant 1.280000e+02 : f32
      %23 = vector.broadcast %cst_19 : f32 to vector<8x1xf32>
      %24 = arith.divf %22, %23 : vector<8x1xf32>
      %25 = vector.broadcast %24 : vector<8x1xf32> to vector<8x128xf32>
      %26 = arith.subf %20, %25 : vector<8x128xf32>
      %27 = arith.mulf %26, %26 : vector<8x128xf32>
      %cst_20 = arith.constant dense<0.000000e+00> : vector<8xf32>
      %28 = vector.multi_reduction <add>, %27, %cst_20 [1] : vector<8x128xf32> to vector<8xf32>
      %29 = vector.shape_cast %28 : vector<8xf32> to vector<8x1xf32>
      %cst_21 = arith.constant 1.280000e+02 : f32
      %30 = vector.broadcast %cst_21 : f32 to vector<8x1xf32>
      %31 = arith.divf %29, %30 : vector<8x1xf32>
      %cst_22 = arith.constant 9.99999974E-6 : f32
      %32 = vector.broadcast %cst_22 : f32 to vector<8x1xf32>
      %33 = arith.addf %31, %32 : vector<8x1xf32>
      %34 = math.rsqrt %33 : vector<8x1xf32>
      %35 = vector.broadcast %34 : vector<8x1xf32> to vector<8x128xf32>
      %36 = arith.mulf %26, %35 : vector<8x128xf32>
      %c0_23 = arith.constant 0 : index
      %c0_24 = arith.constant 0 : index
      %37 = vector.load %arg3[%c0_23, %c0_24] : memref<1x128xf32, #tpu.memory_space<vmem>>, vector<1x128xf32>
      %38 = vector.broadcast %37 : vector<1x128xf32> to vector<8x128xf32>
      %39 = arith.mulf %36, %38 : vector<8x128xf32>
      %c0_25 = arith.constant 0 : index
      %c0_26 = arith.constant 0 : index
      %40 = vector.load %arg4[%c0_25, %c0_26] : memref<1x128xf32, #tpu.memory_space<vmem>>, vector<1x128xf32>
      %41 = vector.broadcast %40 : vector<1x128xf32> to vector<8x128xf32>
      %42 = arith.addf %39, %41 : vector<8x128xf32>
      %43 = arith.truncf %42 : vector<8x128xf32> to vector<8x128xbf16>
      %c0_27 = arith.constant 0 : index
      %c0_28 = arith.constant 0 : index
      %44 = vector.load %arg10[%c0_27, %c0_28] : memref<8x128xbf16, #tpu.memory_space<vmem>>, vector<8x128xbf16>
      tpu.vector_store %arg10[%c0_27, %c0_28], %43 {strides = array<i32>} : memref<8x128xbf16, #tpu.memory_space<vmem>>, vector<8x128xbf16>,
      %cst_29 = arith.constant 0.000000e+00 : f32
      %45 = vector.broadcast %cst_29 : f32 to vector<8x128xf32>
      %c0_30 = arith.constant 0 : index
      %c0_31 = arith.constant 0 : index
      %46 = vector.load %arg11[%c0_30, %c0_31] : memref<8x128xf32, #tpu.memory_space<vmem>>, vector<8x128xf32>
      tpu.vector_store %arg11[%c0_30, %c0_31], %45 {strides = array<i32>} : memref<8x128xf32, #tpu.memory_space<vmem>>, vector<8x128xf32>,
    } else {
    }
    %c0 = arith.constant 0 : index
    %c0_1 = arith.constant 0 : index
    %3 = vector.load %arg10[%c0, %c0_1] : memref<8x128xbf16, #tpu.memory_space<vmem>>, vector<8x128xbf16>
    %c0_2 = arith.constant 0 : index
    %c0_3 = arith.constant 0 : index
    %4 = vector.load %arg5[%c0_2, %c0_3] : memref<128x256xbf16, #tpu.memory_space<vmem>>, vector<128x256xbf16>
    %cst = arith.constant dense<0.000000e+00> : vector<8x256xf32>
    %5 = tpu.matmul %3, %4, %cst {dimension_numbers = #tpu.dot_dimension_numbers<[1], [0], [0], [1], [0, 0, 1, 1], [], []>} : vector<8x128xbf16>, vector<128x256xbf16>, vector<8x256xf32> -> vector<8x256xf32>
    %c0_4 = arith.constant 0 : index
    %c0_5 = arith.constant 0 : index
    %6 = vector.load %arg6[%c0_4, %c0_5] : memref<1x256xf32, #tpu.memory_space<vmem>>, vector<1x256xf32>
    %7 = vector.broadcast %6 : vector<1x256xf32> to vector<8x256xf32>
    %8 = arith.addf %5, %7 : vector<8x256xf32>
    %cst_6 = arith.constant 0.000000e+00 : f32
    %9 = vector.broadcast %cst_6 : f32 to vector<8x256xf32>
    %10 = arith.maximumf %8, %9 : vector<8x256xf32>
    %c0_7 = arith.constant 0 : index
    %c0_8 = arith.constant 0 : index
    %11 = vector.load %arg11[%c0_7, %c0_8] : memref<8x128xf32, #tpu.memory_space<vmem>>, vector<8x128xf32>
    %12 = arith.truncf %10 : vector<8x256xf32> to vector<8x256xbf16>
    %c0_9 = arith.constant 0 : index
    %c0_10 = arith.constant 0 : index
    %13 = vector.load %arg7[%c0_9, %c0_10] : memref<256x128xbf16, #tpu.memory_space<vmem>>, vector<256x128xbf16>
    %cst_11 = arith.constant dense<0.000000e+00> : vector<8x128xf32>
    %14 = tpu.matmul %12, %13, %cst_11 {dimension_numbers = #tpu.dot_dimension_numbers<[1], [0], [0], [1], [0, 0, 1, 1], [], []>} : vector<8x256xbf16>, vector<256x128xbf16>, vector<8x128xf32> -> vector<8x128xf32>
    %15 = arith.addf %11, %14 : vector<8x128xf32>
    %c0_12 = arith.constant 0 : index
    %c0_13 = arith.constant 0 : index
    %16 = vector.load %arg11[%c0_12, %c0_13] : memref<8x128xf32, #tpu.memory_space<vmem>>, vector<8x128xf32>
    tpu.vector_store %arg11[%c0_12, %c0_13], %15 {strides = array<i32>} : memref<8x128xf32, #tpu.memory_space<vmem>>, vector<8x128xf32>,
    %c0_i32_14 = arith.constant 0 : i32
    %17 = arith.cmpi eq, %arg1, %c0_i32_14 : i32
    %18 = arith.extui %17 : i1 to i32
    %c0_i32_15 = arith.constant 0 : i32
    %19 = arith.cmpi ne, %18, %c0_i32_15 : i32
    scf.if %19 {
      %c0_16 = arith.constant 0 : index
      %c0_17 = arith.constant 0 : index
      %20 = vector.load %arg11[%c0_16, %c0_17] : memref<8x128xf32, #tpu.memory_space<vmem>>, vector<8x128xf32>
      %c0_18 = arith.constant 0 : index
      %c0_19 = arith.constant 0 : index
      %21 = vector.load %arg8[%c0_18, %c0_19] : memref<1x128xf32, #tpu.memory_space<vmem>>, vector<1x128xf32>
      %22 = vector.broadcast %21 : vector<1x128xf32> to vector<8x128xf32>
      %23 = arith.addf %20, %22 : vector<8x128xf32>
      %c0_20 = arith.constant 0 : index
      %c0_21 = arith.constant 0 : index
      %24 = vector.load %arg9[%c0_20, %c0_21] : memref<8x128xf32, #tpu.memory_space<vmem>>, vector<8x128xf32>
      tpu.vector_store %arg9[%c0_20, %c0_21], %23 {strides = array<i32>} : memref<8x128xf32, #tpu.memory_space<vmem>>, vector<8x128xf32>,
    } else {
    }
    return
  }
  func.func @transform_0(%arg0: i32, %arg1: i32) -> (i32, i32) {
    %c0_i32 = arith.constant 0 : i32
    %c0_i32_0 = arith.constant 0 : i32
    return %arg0, %c0_i32 : i32, i32
  }
  func.func @transform_1(%arg0: i32, %arg1: i32) -> (i32, i32) {
    %c0_i32 = arith.constant 0 : i32
    %c0_i32_0 = arith.constant 0 : i32
    %c0_i32_1 = arith.constant 0 : i32
    return %c0_i32, %c0_i32_0 : i32, i32
  }
  func.func @transform_2(%arg0: i32, %arg1: i32) -> (i32, i32) {
    %c0_i32 = arith.constant 0 : i32
    %c0_i32_0 = arith.constant 0 : i32
    %c0_i32_1 = arith.constant 0 : i32
    return %c0_i32, %c0_i32_0 : i32, i32
  }
  func.func @transform_3(%arg0: i32, %arg1: i32) -> (i32, i32) {
    %c0_i32 = arith.constant 0 : i32
    %c0_i32_0 = arith.constant 0 : i32
    return %c0_i32, %arg1 : i32, i32
  }
  func.func @transform_4(%arg0: i32, %arg1: i32) -> (i32, i32) {
    %c0_i32 = arith.constant 0 : i32
    %c0_i32_0 = arith.constant 0 : i32
    return %c0_i32, %arg1 : i32, i32
  }
  func.func @transform_5(%arg0: i32, %arg1: i32) -> (i32, i32) {
    %c0_i32 = arith.constant 0 : i32
    %c0_i32_0 = arith.constant 0 : i32
    return %arg1, %c0_i32 : i32, i32
  }
  func.func @transform_6(%arg0: i32, %arg1: i32) -> (i32, i32) {
    %c0_i32 = arith.constant 0 : i32
    %c0_i32_0 = arith.constant 0 : i32
    %c0_i32_1 = arith.constant 0 : i32
    return %c0_i32, %c0_i32_0 : i32, i32
  }
  func.func @transform_7(%arg0: i32, %arg1: i32) -> (i32, i32) {
    %c0_i32 = arith.constant 0 : i32
    %c0_i32_0 = arith.constant 0 : i32
    return %arg0, %c0_i32 : i32, i32
  }
}

</mosaic_0001>

<bundles_post_ra>
// kernel: tpu_custom_call.1
= control target key start
LH: loop header
LB: loop body
LE: loop exit
PB: predicated region body
PF: predicated region fallthrough
CT: control target
= control target key end

     0   :  { %s1615_s0 = inlined_call_operand.hbm [shape: f32[16,128], index: 0, kind: input, shape index: {}]   ;;  %s1616_s1 = inlined_call_operand.hbm [shape: f32[1,128], index: 1, kind: input, shape index: {}]   ;;  %s1617_s2 = inlined_call_operand.vmem [shape: f32[1,128], index: 2, kind: input, shape index: {}]   ;;  %s1618_s3 = inlined_call_operand.hbm [shape: bf16[128,256], index: 3, kind: input, shape index: {}]   ;;  %s1619_s4 = inlined_call_operand.vmem [shape: f32[1,256], index: 4, kind: input, shape index: {}]   ;;  %s1620_s5 = inlined_call_operand.hbm [shape: bf16[256,128], index: 5, kind: input, shape index: {}]   ;;  %s1621_s6 = inlined_call_operand.vmem [shape: f32[1,128], index: 6, kind: input, shape index: {}]   ;;  %s1622_s7 = inlined_call_operand.hbm [shape: f32[16,128], index: 7, kind: output, shape index: {}]  }
   0x1   :  { %1623 = sst [smem:[#allocation17_spill]] %s1616_s1 }
   0x2   :  { %1624 = sst [smem:[#allocation18_spill]] %s1618_s3 }
   0x3   :  { %1625 = sst [smem:[#allocation19_spill]] %s1620_s5 }
   0x4   :  { %12 = vsyncpa [#allocation5], 0 }
   0x5   :  { %14 = vsyncpa [#allocation5 + $0x1], 0 }
   0x6   :  { %15 = vsyncpa [#allocation8], 0 }
   0x7   :  { %16 = vsyncpa [#allocation11], 0 }
   0x8   :  { %17 = vsyncpa [#allocation6], 0 }
   0x9   :  { %19 = vsyncpa [#allocation6 + $0x1], 0  ;;  %s1422_s24 = smov 0   ;;  %s1424_s25 = smov 0  }
   0xa   :  { %s1426_s26 = smov 0   ;;  %s1428_s27 = smov 0  }
   0xb   :  { %s1430_s28 = smov 0   ;;  %s1432_s29 = smov 0  }
   0xc LB: > { %s877_s30 = sadd.s32 4294967295, %s1372_s29   ;;  %s878_s8 = sadd.s32 4294967294, %s1372_s29   ;;  %s1372_s29 = sphi %s1432_s29, %s25_s29   ;;  %s1368_s28 = sphi %s1430_s28, %s1641_s28   ;;  %s1364_s27 = sphi %s1428_s27, %s1640_s27   ;;  %s1360_s26 = sphi %s1426_s26, %s1639_s26   ;;  %s1356_s25 = sphi %s1424_s25, %s1638_s25   ;;  %s1352_s24 = sphi %s1422_s24, %s1637_s24  }
   0xd   : > { %p57_p0 = scmp.ne.s32.totalorder %s1356_s25, %s1352_s24  ;;  %p1456_p1 = scmp.eq.s32.totalorder %s877_s30, 0 }
   0xe   : > { %p1460_p2 = scmp.eq.s32.totalorder %s877_s30, 1  ;;  %p228_p3 = scmp.eq.s32.totalorder %s878_s8, 1 }
   0xf   : > { %p1466_p4 = por %p1456_p1, %p57_p0  ;;  %p879_p5 = scmp.ge.s32.totalorder %s1372_s29, 1 }
  0x10   : > { %p1471_p6 = por %p228_p3, %p57_p0  ;;  %p235_p7 = scmp.lt.s32.totalorder %s1372_s29, 3 }
  0x11   : > { %s1630_s1 = sld [smem:[#allocation17_spill]]  ;;  %p884_p9 = scmp.ge.s32.totalorder %s1372_s29, 2 }
  0x12   : > { %p1479_p8 = pnand %p879_p5, %p235_p7  ;;  %s1374_s17 = smov [#allocation7]  }
  0x13   : > { %s249_s18 = sshll.u32 %s1374_s17, 4  ;;  %s1632_s3 = sld [smem:[#allocation18_spill]]  ;;  %s250_s18 = int_to_ptr.vmem [resolvable:$true] %s249_s18 }
  0x14   : > { %p1073_p10 = pneg %p1479_p8  ;;  %s1375_s23 = smov [#allocation9]  }
  0x15   : > { %s266_s30 = sshll.u32 %s1375_s23, 4  ;;  %s1376_s8 = smov 128   ;;  %s267_s30 = int_to_ptr.vmem [resolvable:$true] %s266_s30 }
  0x16   : > { %p1491_p11 = pnand %p1073_p10, %p1456_p1  ;;  %s1377_s13 = smov 8  }
  0x17   : > { %s247_s15 = sshll.u32 %s1630_s1, 4  ;;  %s1634_s5 = sld [smem:[#allocation19_spill]]  ;;  %s248_s15 = int_to_ptr.hbm [resolvable:$true] %s247_s15 }
  0x18   : > { %1076 = dma.hbm_to_vmem [thread:$0]  (!%p1491_p11), %s248_s15, 16, %s250_s18, [#allocation8]  }
  0x19   : > { %s264_s21 = sshll.u32 %s1632_s3, 4  ;;  %s1378_s20 = smov [#allocation10]   ;;  %s265_s21 = int_to_ptr.hbm [resolvable:$true] %s264_s21 }
  0x1a   : > { %1079 = dma.hbm_to_vmem [thread:$0]  (!%p1491_p11), %s265_s21, 2048, %s267_s30, [#allocation8], %s1376_s8, %s1376_s8, %s1377_s13  }
  0x1b   : > { %s291_s23 = sshll.u32 %s1378_s20, 4  ;;  %s1379_s1 = smov 64   ;;  %s292_s23 = int_to_ptr.vmem [resolvable:$true] %s291_s23 }
  0x1c   : > { %s1380_s15 = smov 4   ;;  %s44_s18 = sadd.s32 1, %s1360_s26 }
  0x1d   : > { %s289_s19 = sshll.u32 %s1634_s5, 4  ;;  %s37_s3 = sadd.s32 1, %s1368_s28  ;;  %s290_s19 = int_to_ptr.hbm [resolvable:$true] %s289_s19 }
  0x1e   : > { %1082 = dma.hbm_to_vmem [thread:$0]  (!%p1491_p11), %s290_s19, 2048, %s292_s23, [#allocation11], %s1379_s1, %s1379_s1, %s1380_s15  }
  0x1f   : > { %p51_p12 = scmp.ne.s32.totalorder %s1360_s26, %s1356_s25  ;;  %p39_p13 = scmp.ge.s32.totalorder %s37_s3, 2 }
  0x20   : > { %p52_p0 = scmp.eq.s32.totalorder %s1372_s29, 0  ;;  %p1094_p5 = scmp.lt.s32.totalorder %s1372_s29, 2 }
  0x21   : > { %p1511_p3 = por %p1460_p2, %p51_p12  ;;  %s1643_s3 = smov (%p39_p13, %s37_s3), 0 }
  0x22   : > { %p1518_p7 = por %p52_p0, %p51_p12  ;;  %s308_s1 = sand.u32 1, %s1360_s26  }
  0x23   : > { %s41_s22 = ssub.s32 %s1368_s28, %s1643_s3  ;;  %s885_s8 = sshll.u32 %s308_s1, 3 }
  0x24   : > { %p42_p10 = scmp.eq.s32.totalorder %s41_s22, 0  ;;  %s886_s13 = sshll.u32 %s1368_s28, 3 }
  0x25   : > { %s316_s19 = scalar_lea.hbm %s1615_s0, %s886_s13  ;;  %s312_s20 = scalar_lea.vmem [#allocation4], %s885_s8 }
  0x26   : > { %s1527_s10 = scalar_select %p42_p10, %s1360_s26, %s44_s18  }
  0x27   : > { %s320_s23 = sshll.u32 %s312_s20, 4  ;;  %s318_s15 = sshll.u32 %s316_s19, 4  ;;  %s321_s23 = int_to_ptr.vmem [resolvable:$true] %s320_s23  ;;  %s319_s15 = int_to_ptr.hbm [resolvable:$true] %s318_s15 }
  0x28   : > { %p1084_p2 = pnand %p1094_p5, %p1518_p7  ;;  %s309_s5 = scalar_lea.sflag [#allocation5], %s308_s1 }
  0x29   : > { %329 = sbr.rel (%p1479_p8) target bundleno = 600 (0x258), region = 48  ;;  %s1539_s18 = sand.u32 (!%p1479_p8), 1, %s1356_s25  }
  0x2a   : > { %1086 = dma.hbm_to_vmem [thread:$0]  (!%p1084_p2), %s319_s15, 128, %s321_s23, %s309_s5  }
  0x2b   : > { %s888_s22 = sshll.u32 (!%p1479_p8), %s1539_s18, 3  ;;  %s332_s8 = scalar_lea.sflag (!%p1479_p8), [#allocation5], %s1539_s18 }
  0x2c   : > { %s335_s13 = scalar_lea.vmem (!%p1479_p8), [#allocation4], %s888_s22 }
  0x2e   : > { %1335 = dma.done.wait (%p1466_p4), %s332_s8, 128  }
  0x2f   : > { %1337 = vsyncadd (%p1466_p4), %s332_s8, 4294967168 }
  0x30   : > { %1339 = dma.done.wait (%p1456_p1), [#allocation8], 2064  }
  0x31   : > { %1341 = vsyncadd (%p1456_p1), [#allocation8], 4294965232 }
  0x32   : > { %1343 = dma.done.wait (%p1456_p1), [#allocation11], 2048  }
  0x33   : > { %1345 = vsyncadd (%p1456_p1), [#allocation11], 4294965248  ;;  %v397_v0 = vld [vmem:[%s335_s13] sm:$0xff]  ;;  %v1381_v1 = vmov 128.0   ;;  %v943_v18 = vld [vmem:[#allocation9 + $0x60] sm:$0xf] }
  0x34   : > { %398 = vadd.xlane.f32.xlu0 %v397_v0  ;;  %1158 = vrcp.f32 %v1381_v1  ;;  %v951_v12 = vld [vmem:[#allocation9 + $0x70] sm:$0xf]  ;;  %v1040_v13 = vld [vmem:[#allocation9 + $0x74] sm:$0xf0]  ;;  %v1039_v14 = vld [vmem:[#allocation9 + $0x74] sm:$0xf] }
  0x35   : > { %v952_v15 = vor.u32 %v1040_v13, %v951_v12  ;;  %v953_v16 = vld [vmem:[#allocation9 + $0x78] sm:$0xf0]  ;;  %v1038_v19 = vld [vmem:[#allocation9 + $0x64] sm:$0xf0]  ;;  %v1037_v20 = vld [vmem:[#allocation9 + $0x64] sm:$0xf] }
  0x36   : > { %v956_v17 = vor.u32 %v1039_v14, %v953_v16  ;;  %v944_v21 = vor.u32 %v1038_v19, %v943_v18  ;;  %v945_v22 = vld [vmem:[#allocation9 + $0x68] sm:$0xf0]  ;;  %v935_v24 = vld [vmem:[#allocation9 + $0x50] sm:$0xf]  ;;  %v1036_v25 = vld [vmem:[#allocation9 + $0x54] sm:$0xf0] }
  0x37   : > { %541 = vmatpush.bf16.msra.mxu0 %v952_v15  ;;  %v948_v23 = vor.u32 %v1037_v20, %v945_v22  ;;  %v1035_v26 = vld [vmem:[#allocation9 + $0x54] sm:$0xf]  ;;  %v936_v27 = vor.u32 %v1036_v25, %v935_v24  ;;  %v937_v28 = vld [vmem:[#allocation9 + $0x58] sm:$0xf0]  ;;  %v927_v30 = vld [vmem:[#allocation9 + $0x40] sm:$0xf] }
  0x38   : > { %554 = vmatpush.bf16.msra.mxu1 %v956_v17  ;;  %v940_v29 = vor.u32 %v1035_v26, %v937_v28  ;;  %v1034_v31 = vld [vmem:[#allocation9 + $0x44] sm:$0xf0]  ;;  %v1033_v32 = vld [vmem:[#allocation9 + $0x44] sm:$0xf]  ;;  %v929_v34 = vld [vmem:[#allocation9 + $0x48] sm:$0xf0] }
  0x39   : > { %v928_v33 = vor.u32 %v1034_v31, %v927_v30  ;;  %v932_v35 = vor.u32 %v1033_v32, %v929_v34  ;;  %v919_v36 = vld [vmem:[#allocation9 + $0x30] sm:$0xf]  ;;  %v1032_v37 = vld [vmem:[#allocation9 + $0x34] sm:$0xf0]  ;;  %v1031_v38 = vld [vmem:[#allocation9 + $0x34] sm:$0xf] }
  0x3a   : > { %v1159_v2 = vpop.eup %1158  ;;  %v920_v39 = vor.u32 %v1032_v37, %v919_v36  ;;  %v921_v40 = vld [vmem:[#allocation9 + $0x38] sm:$0xf0]  ;;  %v911_v42 = vld [vmem:[#allocation9 + $0x20] sm:$0xf]  ;;  %v1030_v43 = vld [vmem:[#allocation9 + $0x24] sm:$0xf0] }
  0x3b   : > { %v401_v3 = vmul.f32 128.0, %v1159_v2  ;;  %vm405_vm0 = vweird.f32 %v1159_v2  ;;  %542 = vmatpush.bf16.msra.mxu0 %v944_v21  ;;  %v924_v41 = vor.u32 %v1031_v38, %v921_v40  ;;  %v1029_v44 = vld [vmem:[#allocation9 + $0x24] sm:$0xf]  ;;  %v912_v45 = vor.u32 %v1030_v43, %v911_v42  ;;  %v913_v46 = vld [vmem:[#allocation9 + $0x28] sm:$0xf0]  ;;  %v1048_v63 = vld [vmem:[#allocation10 + $0x38] sm:$0xff] }
  0x3c   : > { %555 = vmatpush.bf16.msra.mxu1 %v948_v23  ;;  %v916_v47 = vor.u32 %v1029_v44, %v913_v46  ;;  %v903_v48 = vld [vmem:[#allocation9 + $0x10] sm:$0xf]  ;;  %v1028_v49 = vld [vmem:[#allocation9 + $0x14] sm:$0xf0]  ;;  %v1027_v50 = vld [vmem:[#allocation9 + $0x14] sm:$0xf]  ;;  %700 = vmatpush.bf16.msra.mxu2 %v1048_v63 }
  0x3d   : > { %v402_v4 = vsub.f32 1.0, %v401_v3  ;;  %v904_v51 = vor.u32 %v1028_v49, %v903_v48  ;;  %v905_v52 = vld [vmem:[#allocation9 + $0x18] sm:$0xf0]  ;;  %v895_v54 = vld [vmem:[#allocation9] sm:$0xf]  ;;  %v1047_v1 = vld [vmem:[#allocation10 + $0x30] sm:$0xff] }
  0x3e   : > { %v908_v53 = vor.u32 %v1027_v50, %v905_v52  ;;  %v1026_v55 = vld [vmem:[#allocation9 + $0x4] sm:$0xf0]  ;;  %v1025_v56 = vld [vmem:[#allocation9 + $0x4] sm:$0xf]  ;;  %v897_v59 = vld [vmem:[#allocation9 + $0x8] sm:$0xf0] }
  0x3f   : > { %v403_v5 = vmul.f32 %v1159_v2, %v402_v4  ;;  %543 = vmatpush.bf16.msra.mxu0 %v936_v27  ;;  %v896_v58 = vor.u32 %v1026_v55, %v895_v54  ;;  %v900_v61 = vor.u32 %v1025_v56, %v897_v59  ;;  %v1155_v13 = vld [vmem:[#allocation7] ss:$0 sm:$0xff]  ;;  %v1156_v18 = vld [vmem:[%s1617_s2] ss:$0 sm:$0xff]  ;;  %v1043_v21 = vld [vmem:[#allocation10 + $0x10] sm:$0xff]  ;;  %s1022_s30 = sshll.u32 %s1364_s27, 3 }
  0x40   : > { %556 = vmatpush.bf16.msra.mxu1 %v940_v29  ;;  %701 = vmatpush.bf16.msra.mxu2 %v1047_v1  ;;  %v1044_v15 = vld [vmem:[#allocation10 + $0x18] sm:$0xff]  ;;  %v1051_v22 = vld [vmem:[#allocation10 + $0x50] sm:$0xff]  ;;  %v1042_v26 = vld [vmem:[#allocation10 + $0x8] sm:$0xff]  ;;  %s749_s17 = scalar_lea.hbm %s1622_s7, %s1022_s30  ;;  %s385_s23 = scalar_lea.vmem [#allocation12], %s888_s22 }
  0x41   : > { %v404_v6 = vadd.f32 %v1159_v2, %v403_v5  ;;  %v1046_v5 = vld [vmem:[#allocation10 + $0x28] sm:$0xff]  ;;  %v1052_v16 = vld [vmem:[#allocation10 + $0x58] sm:$0xff]  ;;  %v1041_v28 = vld [vmem:[#allocation10] sm:$0xff]  ;;  %s751_s15 = sshll.u32 %s385_s23, 4  ;;  %s753_s8 = sshll.u32 %s749_s17, 4  ;;  %s752_s15 = int_to_ptr.vmem [resolvable:$true] %s751_s15  ;;  %s754_s8 = int_to_ptr.hbm [resolvable:$true] %s753_s8 }
  0x42   : > { %v1050_v27 = vld [vmem:[#allocation10 + $0x48] sm:$0xff]  ;;  %v1049_v29 = vld [vmem:[#allocation10 + $0x40] sm:$0xff]  ;;  %s739_s27 = scalar_lea.sflag [#allocation6], %s1539_s18  ;;  %s1296_s13 = sshra.s32 %s754_s8, 4  ;;  %s1297_s13 = int_to_ptr.hbm [resolvable:$true] %s1296_s13 }
  0x43   : > { %v1557_v7 = vsel %vm405_vm0, %v1159_v2, %v404_v6  ;;  %544 = vmatpush.bf16.msra.mxu0 %v928_v33  ;;  %v1055_v2 = vld [vmem:[#allocation10 + $0x70] sm:$0xff]  ;;  %v1054_v6 = vld [vmem:[#allocation10 + $0x68] sm:$0xff]  ;;  %s1298_s5 = scalar_lea.hbm %s1297_s13, 8  ;;  %s1302_s16 = scalar_lea.hbm %s1622_s7, 16 }
  0x44   : > { %557 = vmatpush.bf16.msra.mxu1 %v932_v35  ;;  %702 = vmatpush.bf16.msra.mxu2 %v1046_v5  ;;  %v1157_v42 = vld [vmem:[%s1621_s6] ss:$0 sm:$0xff]  ;;  %p1299_p1 = scmp.ne.s32.totalorder %s1297_s13, %s1298_s5  ;;  %p1303_p11 = scmp.lt.s32.totalorder %s1297_s13, %s1622_s7 }
  0x45   : > { %p1304_p12 = scmp.lt.s32.totalorder %s1302_s16, %s1298_s5 }
  0x46   : > { %p1300_p4 = pnand %p1299_p1, %p1511_p3 }
  0x47   : > { %545 = vmatpush.bf16.msra.mxu0 %v920_v39  ;;  %p1305_p13 = por %p1304_p12, %p1303_p11 }
  0x48   : > { %558 = vmatpush.bf16.msra.mxu1 %v924_v41  ;;  %p1301_p8 = pneg %p1300_p4 }
  0x4a   : > { %p1306_p0 = pnand %p1305_p13, %p1301_p8 }
  0x4b   : > { %546 = vmatpush.bf16.msra.mxu0 %v912_v45 }
  0x4c   : > { %559 = vmatpush.bf16.msra.mxu1 %v916_v47 }
  0x4f   : > { %547 = vmatpush.bf16.msra.mxu0 %v904_v51 }
  0x50   : > { %560 = vmatpush.bf16.msra.mxu1 %v908_v53 }
  0x53   : > { %548 = vmatpush.bf16.msra.mxu0 %v896_v58 }
  0x54   : > { %561 = vmatpush.bf16.msra.mxu1 %v900_v61 }
  0xa7   : > { %v399_v8 = vpop.xlane.xlu0 %398 }
  0xa8   : > { %v407_v9 = vmul.f32 %v1557_v7, %v399_v8 }
  0xaa   : > { %v1560_v10 = vsub.f32 %v397_v0, %v407_v9  ;;  %v1056_v0 = vld [vmem:[#allocation10 + $0x78] sm:$0xff]  ;;  %v1045_v9 = vld [vmem:[#allocation10 + $0x20] sm:$0xff] }
  0xab   : > { %713 = vmatpush.bf16.msra.mxu3 %v1056_v0  ;;  %703 = vmatpush.bf16.msra.mxu2 %v1045_v9 }
  0xac   : > { %v409_v11 = vmul.f32 %v1560_v10, %v1560_v10 }
  0xae   : > { %410 = vadd.xlane.f32.xlu0 %v409_v11  ;;  %v1053_v11 = vld [vmem:[#allocation10 + $0x60] sm:$0xff] }
  0xaf   : > { %714 = vmatpush.bf16.msra.mxu3 %v1055_v2  ;;  %704 = vmatpush.bf16.msra.mxu2 %v1044_v15 }
  0xb3   : > { %715 = vmatpush.bf16.msra.mxu3 %v1054_v6  ;;  %705 = vmatpush.bf16.msra.mxu2 %v1043_v21 }
  0xb7   : > { %716 = vmatpush.bf16.msra.mxu3 %v1053_v11  ;;  %706 = vmatpush.bf16.msra.mxu2 %v1042_v26 }
  0xbb   : > { %717 = vmatpush.bf16.msra.mxu3 %v1052_v16  ;;  %707 = vmatpush.bf16.msra.mxu2 %v1041_v28 }
  0xbf   : > { %718 = vmatpush.bf16.msra.mxu3 %v1051_v22 }
  0xc3   : > { %719 = vmatpush.bf16.msra.mxu3 %v1050_v27 }
  0xc7   : > { %720 = vmatpush.bf16.msra.mxu3 %v1049_v29 }
 0x121   : > { %v411_v57 = vpop.xlane.xlu0 %410 }
 0x122   : > { %v412_v60 = vmul.f32 %v411_v57, %v1557_v7 }
 0x124   : > { %v413_v62 = vadd.f32 1e-05, %v412_v60 }
 0x126   : > { %1160 = vrsqrt.f32 %v413_v62  ;;  %vm420_vm2 = vweird.f32 %v413_v62 }
 0x12c   : > { %v1161_v3 = vpop.eup %1160 }
 0x12d   : > { %v415_v4 = vmul.f32 %v1161_v3, %v413_v62  ;;  %vm421_vm1 = vweird.f32 %v1161_v3 }
 0x12e   : > { %vm422_vm3 = vmor %vm420_vm2, %vm421_vm1 }
 0x12f   : > { %v416_v8 = vmul.f32 %v1161_v3, %v415_v4 }
 0x131   : > { %v417_v7 = vmul.f32 0.5, %v416_v8 }
 0x133   : > { %v418_v12 = vsub.f32 1.5, %v417_v7 }
 0x135   : > { %v419_v14 = vmul.f32 %v1161_v3, %v418_v12 }
 0x137   : > { %v423_v17 = vsel %vm422_vm3, %v1161_v3, %v419_v14 }
 0x138   : > { %v424_v19 = vmul.f32 %v423_v17, %v1560_v10  ;;  %v455_v10 = vld [vmem:[%s1619_s4] sm:$0x3] }
 0x139   : > { %v457_v30 = vperm.slane %v455_v10, 0  ;;  %v458_v31 = vperm.slane %v455_v10, 1 }
 0x13a   : > { %v429_v20 = vmul.f32 %v1155_v13, %v424_v19 }
 0x13c   : > { %v434_v23 = vadd.f32 %v1156_v18, %v429_v20 }
 0x13e   : > { %v435_v24 = vpack.c.bf16 %v434_v23, %v434_v23 }
 0x140   : > { %436 = vst [vmem:[#allocation2] sm:$0xf] %v435_v24 }
 0x147   : > { %v438_v25 = vld [vmem:[#allocation2] sm:$0xf] }
 0x148   : > { %549 = vmatmul.bf16.vlgmr.msra.gmra.mxu0 %v438_v25  ;;  %562 = vmatmul.bf16.vlgmr.msra.gmra.mxu1 %v438_v25 }
 0x1c5   : > { %v550_v32 = vpop.f32.mrf.mxu0  ;;  %v563_v33 = vpop.f32.mrf.mxu1 }
 0x1c6   : > { %v551_v34 = vadd.f32 %v550_v32, %v457_v30  ;;  %v564_v35 = vadd.f32 %v563_v33, %v458_v31 }
 0x1c8   : > { %v567_v36 = vmax.f32 %v551_v34, 0.0  ;;  %v568_v37 = vmax.f32 %v564_v35, 0.0 }
 0x1ca   : > { %v570_v38 = vpack.c.bf16 %v567_v36, %v567_v36  ;;  %v571_v39 = vpack.c.bf16 %v568_v37, %v568_v37 }
 0x1cc   : > { %708 = vmatmul.bf16.vlgmr.msra.gmra.mxu2 %v570_v38  ;;  %721 = vmatmul.bf16.vlgmr.msra.gmra.mxu3 %v571_v39 }
 0x1cd   : > { %v552_v40 = vpop.f32.mrf.mxu0  ;;  %v565_v41 = vpop.f32.mrf.mxu1 }
 0x24f   : > { %v709_v43 = vpop.f32.mrf.mxu2  ;;  %v722_v44 = vpop.f32.mrf.mxu3 }
 0x250   : > { %v723_v45 = vadd.f32 %v722_v44, %v709_v43 }
 0x252   : > { %v736_v46 = vadd.f32 %v1157_v42, %v723_v45 }
 0x254   : > { %737 = vst [vmem:[%s385_s23] sm:$0xff] %v736_v46 }
 0x255   : > { %1309 = shalt.err (!%p1306_p0)
}
 0x256   : > { %1071 = dma.vmem_to_hbm [thread:$0]  (%p1511_p3), %s752_s15, 128, %s754_s8, %s739_s27  }
 0x257   : > { %v711_v47 = vpop.f32.mrf.mxu2  ;;  %v724_v48 = vpop.f32.mrf.mxu3 }
 0x258 PF: > { %s765_s18 = sand.u32 1, %s1352_s24   ;;  %p1088_p5 = pnand %p884_p9, %p1471_p6 }
 0x259   : > { %s766_s1 = scalar_lea.sflag [#allocation6], %s765_s18 }
 0x25a   : > { %p1089_p7 = pneg %p1088_p5 }
 0x25c   : > { %1347 = dma.done.wait (%p1089_p7), %s766_s1, 128  }
 0x25d   : > { %1349 = vsyncadd (%p1089_p7), %s766_s1, 4294967168  ;;  %s25_s29 = sadd.s32 1, %s1372_s29   ;;  %s1637_s24 = smov %s1356_s25 }
 0x25e   : > { %p22_p10 = scmp.ge.s32.totalorder %s25_s29, 4   ;;  %s1638_s25 = smov %s1360_s26 }
 0x25f   : > { %s1639_s26 = smov %s1527_s10  ;;  %s1640_s27 = smov %s1368_s28 }
 0x260   : > { %s1641_s28 = smov %s1643_s3  ;;  %24 = sbr.rel (!%p22_p10) target bundleno = 12 (0xc), region = 118 }
 0x265   :  { %772 = vsyncpa [#allocation5], 1 }
 0x266   :  { %774 = vsyncpa [#allocation5 + $0x1], 1 }
 0x267   :  { %775 = vsyncpa [#allocation8], 1 }
 0x268   :  { %776 = vsyncpa [#allocation11], 1 }
 0x269   :  { %777 = vsyncpa [#allocation6], 1 }
 0x26a   :  { %779 = vsyncpa [#allocation6 + $0x1], 1 }

</bundles_post_ra>
